<compile_context>
chip_gen: v5e
topology: v5e:2x2
jax: 0.10.0
libtpu: 0.0.40
codegen_flags: <defaults>
</compile_context>

<pallas_src>
import functools

import jax
import jax.numpy as jnp
from jax import lax
from jax.experimental import pallas as pl
from jax.experimental.pallas import tpu as pltpu

_RING = 8            # DMA-semaphore ring depth for the HBM gather path
_MAX_TILE_ROWS = 512  # batch rows per grid step (cap)


def _round_up(n, m):
    return ((n + m - 1) // m) * m


def _sublane_pack(*dtypes):
    """Rows per packed vreg tile for the narrowest dtype: f32->8, bf16->16, i8->32."""
    itemsize = min(jnp.dtype(d).itemsize for d in dtypes)
    return max(8, 32 // itemsize)


def _centers_vmem_bytes_threshold():
    """Break-even size for streaming the full centers matrix into VMEM."""
    try:
        kind = jax.devices()[0].device_kind.lower()
    except Exception:
        kind = ""
    if "v5 lite" in kind or "v5e" in kind or "v5lite" in kind:
        return 4 << 20   # v5e: ~0.8 TB/s HBM -> streaming full centers pays off later
    return 8 << 20       # v6e / v7x


# ---------------------------------------------------------------------------
# Path 1: centers resident in VMEM, one-hot MXU gather (small / medium C).
# ---------------------------------------------------------------------------
def _center_loss_vmem_kernel(lbl_ref, x_ref, centers_ref, out_ref, *,
                             batch_size, tile_rows, num_classes):
    """lbl_ref: (TB, 1) int32; x_ref: (TB, D); centers_ref: (C, D) resident;
       out_ref: (1, 8, 128) lane-dense per-tile partial sum."""
    i = pl.program_id(0)

    lbl = lbl_ref[...]                                            # (TB, 1)
    cls = lax.broadcasted_iota(jnp.int32, (tile_rows, num_classes), 1)
    onehot = (lbl == cls).astype(centers_ref.dtype)               # exact 0/1
    own_center = jnp.dot(onehot, centers_ref[...],
                         preferred_element_type=jnp.float32)      # MXU gather (TB, D)

    diff = x_ref[...].astype(jnp.float32) - own_center
    dist = jnp.sum(diff * diff, axis=1, keepdims=True)            # (TB, 1)
    dist = jnp.clip(dist, 1e-12, 1e12)

    rows = i * tile_rows + lax.broadcasted_iota(jnp.int32, (tile_rows, 1), 0)
    dist = jnp.where(rows < batch_size, dist, 0.0)                # drop padded rows

    out_ref[...] = jnp.full((1, 8, 128), jnp.sum(dist), dtype=jnp.float32)


# ---------------------------------------------------------------------------
# Path 2: HBM DMA gather of labeled rows, semaphore ring (large C).
# ---------------------------------------------------------------------------
def _center_loss_gather_kernel(labels_ref, x_ref, centers_hbm, out_ref,
                               gathered, sems, *, batch_size, tile_rows):
    """labels_ref: SMEM (b_pad,) int32 (scalar-prefetched); x_ref: (TB, D) VMEM;
       centers_hbm: raw HBM (C, D); out_ref: (1, 8, 128) partial;
       gathered: VMEM (TB, D) scratch; sems: DMA semaphore ring (_RING,)."""
    i = pl.program_id(0)
    row0 = i * tile_rows

    def start(b, slot):
        pltpu.make_async_copy(
            centers_hbm.at[pl.ds(labels_ref[row0 + b], 1), :],
            gathered.at[pl.ds(b, 1), :],
            sems.at[slot],
        ).start()

    def wait_slot(slot):
        # Shape-matched dummy slices: .wait() only needs the transfer size.
        pltpu.make_async_copy(
            centers_hbm.at[pl.ds(0, 1), :],
            gathered.at[pl.ds(0, 1), :],
            sems.at[slot],
        ).wait()

    # Prime the ring (static, <= _RING iterations).
    for b in range(min(_RING, tile_rows)):
        start(b, b)

    # Wait-behind / start-ahead: at most _RING gathers in flight.
    def body(b, carry):
        slot = b & (_RING - 1)
        wait_slot(slot)

        @pl.when(b + _RING < tile_rows)
        def _():
            start(b + _RING, slot)

        return carry

    lax.fori_loop(0, tile_rows, body, 0,
                  unroll=True if tile_rows <= 64 else 8)

    diff = x_ref[...].astype(jnp.float32) - gathered[...].astype(jnp.float32)
    dist = jnp.sum(diff * diff, axis=1, keepdims=True)            # (TB, 1)
    dist = jnp.clip(dist, 1e-12, 1e12)

    rows = row0 + lax.broadcasted_iota(jnp.int32, (tile_rows, 1), 0)
    dist = jnp.where(rows < batch_size, dist, 0.0)

    out_ref[...] = jnp.full((1, 8, 128), jnp.sum(dist), dtype=jnp.float32)


# ---------------------------------------------------------------------------
# Wrapper
# ---------------------------------------------------------------------------
def center_loss(x, centers, labels, *, path="auto"):
    """Center-loss forward.  x: (B, D); centers: (C, D); labels: (B,) int in [0, C).

    path: "auto" (pick by centers size), "vmem" (force VMEM-resident centers),
          "gather" (force HBM DMA gather of labeled rows).
    NOTE: labels must be valid class indices; an out-of-range label would break
    the analytic clamp-after-mask constant and (gather path) DMA an OOB row.
    """
    B, D = x.shape
    C, Dc = centers.shape
    assert D == Dc, (D, Dc)
    labels = labels.astype(jnp.int32)

    x_bytes = jnp.dtype(x.dtype).itemsize
    c_bytes = jnp.dtype(centers.dtype).itemsize
    pack = _sublane_pack(x.dtype, centers.dtype)

    centers_bytes = C * D * c_bytes
    use_vmem = (path == "vmem") or (
        path == "auto" and centers_bytes <= _centers_vmem_bytes_threshold())

    # ---- batch tiling: biggest tile under a per-tile VMEM row budget --------
    if use_vmem:
        per_row = 2 * D * x_bytes + C * c_bytes + 2 * D * 4   # x (dbl-buf) + one-hot + f32 work
    else:
        per_row = 2 * D * x_bytes + D * c_bytes + 2 * D * 4   # x (dbl-buf) + gathered + f32 work
    row_budget = 8 << 20
    tile_cap = max(pack, (row_budget // max(per_row, 1)) // pack * pack)
    tile_rows = min(_MAX_TILE_ROWS, tile_cap, _round_up(B, pack))
    tile_rows = max(pack, (tile_rows // pack) * pack)

    b_pad = _round_up(B, tile_rows)
    num_tiles = b_pad // tile_rows

    if b_pad != B:
        x = jnp.pad(x, ((0, b_pad - B), (0, 0)))
        labels = jnp.pad(labels, (0, b_pad - B))   # class 0: valid index, masked out

    # Explicit VMEM limit with headroom (v7x has only 64 MiB physical per TC).
    if use_vmem:
        vmem_need = (centers_bytes + 2 * tile_rows * D * x_bytes
                     + tile_rows * C * c_bytes + 2 * tile_rows * D * 4
                     + 2 * 8 * 128 * 4)
    else:
        vmem_need = (2 * tile_rows * D * x_bytes + tile_rows * D * c_bytes
                     + 2 * tile_rows * D * 4 + 2 * 8 * 128 * 4)
    vmem_limit = int(min(64 << 20, max(32 << 20, 2 * vmem_need)))

    out_shape = jax.ShapeDtypeStruct((num_tiles, 8, 128), jnp.float32)
    compiler_params = pltpu.CompilerParams(
        dimension_semantics=("parallel",),        # batch tiles: both TCs on v7x
        vmem_limit_bytes=vmem_limit)

    if use_vmem:
        kernel = functools.partial(_center_loss_vmem_kernel, batch_size=B,
                                   tile_rows=tile_rows, num_classes=C)
        cost = pl.CostEstimate(
            flops=int(2 * b_pad * C * D + 3 * b_pad * D),
            transcendentals=0,
            bytes_accessed=int(centers_bytes + b_pad * D * x_bytes
                               + num_tiles * 8 * 128 * 4))
        partials = pl.pallas_call(
            kernel,
            out_shape=out_shape,
            grid_spec=pltpu.PrefetchScalarGridSpec(
                num_scalar_prefetch=0,
                grid=(num_tiles,),
                in_specs=[
                    pl.BlockSpec((tile_rows, 1), lambda i: (i, 0)),    # labels
                    pl.BlockSpec((tile_rows, D), lambda i: (i, 0)),    # x
                    pl.BlockSpec((C, D), lambda i: (0, 0)),            # centers, resident
                ],
                out_specs=pl.BlockSpec((1, 8, 128), lambda i: (i, 0, 0)),
            ),
            compiler_params=compiler_params,
            cost_estimate=cost,
        )(labels.reshape(b_pad, 1), x, centers)
    else:
        kernel = functools.partial(_center_loss_gather_kernel, batch_size=B,
                                   tile_rows=tile_rows)
        cost = pl.CostEstimate(
            flops=int(3 * b_pad * D),
            transcendentals=0,
            bytes_accessed=int(b_pad * D * (x_bytes + c_bytes)
                               + num_tiles * 8 * 128 * 4))
        partials = pl.pallas_call(
            kernel,
            out_shape=out_shape,
            grid_spec=pltpu.PrefetchScalarGridSpec(
                num_scalar_prefetch=1,                                 # labels -> SMEM
                grid=(num_tiles,),
                in_specs=[
                    pl.BlockSpec((tile_rows, D), lambda i, lbl: (i, 0)),  # x
                    pl.BlockSpec(memory_space=pl.ANY),                    # centers in HBM
                ],
                out_specs=pl.BlockSpec((1, 8, 128), lambda i, lbl: (i, 0, 0)),
                scratch_shapes=[
                    pltpu.VMEM((tile_rows, D), centers.dtype),            # gathered rows
                    pltpu.SemaphoreType.DMA((_RING,)),                    # sem ring
                ],
            ),
            compiler_params=compiler_params,
            cost_estimate=cost,
        )(labels, x, centers)

    total = jnp.sum(partials[:, 0, 0])
    # Mask-then-clamp quirk: every non-label entry contributes exactly 1e-12.
    const = jnp.float32(B) * jnp.float32(C - 1) * jnp.float32(1e-12)
    return (total + const) / jnp.float32(B)


def center_loss_reference(x, centers, labels):
    """Pure-JAX reference mirroring the PyTorch forward exactly."""
    B = labels.shape[0]
    C = centers.shape[0]
    distmat = (
        jnp.sum(x ** 2, axis=1, keepdims=True)
        + jnp.sum(centers ** 2, axis=1, keepdims=True).T
        - 2.0 * x @ centers.T
    )
    classes = jnp.arange(C, dtype=jnp.int32)
    mask = labels[:, None] == classes[None, :]
    dist = distmat * mask.astype(distmat.dtype)
    return jnp.sum(jnp.clip(dist, 1e-12, 1e12)) / B


if __name__ == "__main__":
    # Small, Pallas-friendly shapes consistent with the module's forward.
    num_classes = 1024
    feat_dim = 128
    batch = 8

    key = jax.random.PRNGKey(0)
    k_c, k_x, k_l = jax.random.split(key, 3)

    # Deterministic parameter init (module: torch.randn(num_classes, feat_dim)).
    centers = jax.random.normal(k_c, (num_classes, feat_dim), dtype=jnp.float32)
    x = jax.random.normal(k_x, (batch, feat_dim), dtype=jnp.float32)
    labels = jax.random.randint(k_l, (batch,), 0, num_classes, dtype=jnp.int32)

    ref = jax.block_until_ready(center_loss_reference(x, centers, labels))

    # Fast path: centers resident in VMEM, one-hot MXU gather (auto-selected here).
    loss_fast = jax.block_until_ready(center_loss(x, centers, labels, path="auto"))
    assert jnp.allclose(loss_fast, ref, rtol=1e-5, atol=1e-5), (loss_fast, ref)

    # Large-C path: HBM DMA gather with a semaphore ring (forced for coverage).
    loss_gather = jax.block_until_ready(center_loss(x, centers, labels, path="gather"))
    assert jnp.allclose(loss_gather, ref, rtol=1e-5, atol=1e-5), (loss_gather, ref)

    print("KERNEL_OK")
</pallas_src>

<mosaic_0001>
module attributes {stable_mosaic.version = 11 : i64} {
  func.func @_center_loss_vmem_kernel(%arg0: i32, %arg1: memref<8x1xi32, #tpu.memory_space<vmem>>, %arg2: memref<8x128xf32, #tpu.memory_space<vmem>>, %arg3: memref<1024x128xf32, #tpu.memory_space<vmem>>, %arg4: memref<1x8x128xf32, #tpu.memory_space<vmem>>) attributes {dimension_semantics = [#tpu.dimension_semantics<parallel>], iteration_bounds = array<i64: 1>, scalar_prefetch = 0 : i64, scratch_operands = 0 : i64, tpu.core_type = #tpu.core_type<tc>, window_params = [{transform_indices = @transform_0, window_bounds = array<i64: 8, 1>}, {transform_indices = @transform_1, window_bounds = array<i64: 8, 128>}, {pipeline_mode = #tpu.pipeline_mode<synchronous>, transform_indices = @transform_2, window_bounds = array<i64: 1024, 128>}, {transform_indices = @transform_3, window_bounds = array<i64: 1, 8, 128>}]} {
    %c0 = arith.constant 0 : index
    %c0_0 = arith.constant 0 : index
    %0 = vector.load %arg1[%c0, %c0_0] : memref<8x1xi32, #tpu.memory_space<vmem>>, vector<8x1xi32>
    %1 = tpu.iota {dimensions = array<i32: 1>} : vector<8x1024xi32>
    %2 = vector.broadcast %0 : vector<8x1xi32> to vector<8x1024xi32>
    %3 = arith.cmpi eq, %2, %1 : vector<8x1024xi32>
    %4 = arith.extui %3 : vector<8x1024xi1> to vector<8x1024xi32>
    %5 = arith.sitofp %4 : vector<8x1024xi32> to vector<8x1024xf32>
    %c0_1 = arith.constant 0 : index
    %c0_2 = arith.constant 0 : index
    %6 = vector.load %arg3[%c0_1, %c0_2] : memref<1024x128xf32, #tpu.memory_space<vmem>>, vector<1024x128xf32>
    %cst = arith.constant dense<0.000000e+00> : vector<8x128xf32>
    %7 = tpu.matmul %5, %6, %cst {dimension_numbers = #tpu.dot_dimension_numbers<[1], [0], [0], [1], [0, 0, 1, 1], [], []>} : vector<8x1024xf32>, vector<1024x128xf32>, vector<8x128xf32> -> vector<8x128xf32>
    %c0_3 = arith.constant 0 : index
    %c0_4 = arith.constant 0 : index
    %8 = vector.load %arg2[%c0_3, %c0_4] : memref<8x128xf32, #tpu.memory_space<vmem>>, vector<8x128xf32>
    %9 = arith.subf %8, %7 : vector<8x128xf32>
    %10 = arith.mulf %9, %9 : vector<8x128xf32>
    %cst_5 = arith.constant dense<0.000000e+00> : vector<8xf32>
    %11 = vector.multi_reduction <add>, %10, %cst_5 [1] : vector<8x128xf32> to vector<8xf32>
    %12 = vector.shape_cast %11 : vector<8xf32> to vector<8x1xf32>
    %cst_6 = arith.constant 9.99999996E-13 : f32
    %cst_7 = arith.constant 9.99999995E+11 : f32
    %13 = vector.broadcast %cst_6 : f32 to vector<8x1xf32>
    %14 = arith.maximumf %13, %12 : vector<8x1xf32>
    %15 = vector.broadcast %cst_7 : f32 to vector<8x1xf32>
    %16 = arith.minimumf %15, %14 : vector<8x1xf32>
    %c8_i32 = arith.constant 8 : i32
    %17 = arith.muli %arg0, %c8_i32 : i32
    %18 = tpu.iota {dimensions = array<i32: 0>} : vector<8x1xi32>
    %19 = vector.broadcast %17 : i32 to vector<8x1xi32>
    %20 = arith.addi %19, %18 : vector<8x1xi32>
    %c8_i32_8 = arith.constant 8 : i32
    %21 = vector.broadcast %c8_i32_8 : i32 to vector<8x1xi32>
    %22 = arith.cmpi slt, %20, %21 : vector<8x1xi32>
    %cst_9 = arith.constant 0.000000e+00 : f32
    %23 = vector.broadcast %cst_9 : f32 to vector<8x1xf32>
    %24 = arith.select %22, %16, %23 : vector<8x1xi1>, vector<8x1xf32>
    %25 = vector.shape_cast %24 : vector<8x1xf32> to vector<1x8x1xf32>
    %cst_10 = arith.constant dense<0.000000e+00> : vector<1xf32>
    %26 = vector.multi_reduction <add>, %25, %cst_10 [1, 2] : vector<1x8x1xf32> to vector<1xf32>
    %27 = vector.shape_cast %26 : vector<1xf32> to vector<1x1x1xf32>
    %28 = vector.extract %27[0, 0, 0] : f32 from vector<1x1x1xf32>
    %29 = vector.broadcast %28 : f32 to vector<1x8x128xf32>
    %c0_11 = arith.constant 0 : index
    %c0_12 = arith.constant 0 : index
    %c0_13 = arith.constant 0 : index
    %30 = vector.load %arg4[%c0_11, %c0_12, %c0_13] : memref<1x8x128xf32, #tpu.memory_space<vmem>>, vector<1x8x128xf32>
    tpu.vector_store %arg4[%c0_11, %c0_12, %c0_13], %29 {strides = array<i32>} : memref<1x8x128xf32, #tpu.memory_space<vmem>>, vector<1x8x128xf32>,
    return
  }
  func.func @transform_0(%arg0: i32) -> (i32, i32) {
    %c0_i32 = arith.constant 0 : i32
    %c0_i32_0 = arith.constant 0 : i32
    return %arg0, %c0_i32 : i32, i32
  }
  func.func @transform_1(%arg0: i32) -> (i32, i32) {
    %c0_i32 = arith.constant 0 : i32
    %c0_i32_0 = arith.constant 0 : i32
    return %arg0, %c0_i32 : i32, i32
  }
  func.func @transform_2(%arg0: i32) -> (i32, i32) {
    %c0_i32 = arith.constant 0 : i32
    %c0_i32_0 = arith.constant 0 : i32
    %c0_i32_1 = arith.constant 0 : i32
    return %c0_i32, %c0_i32_0 : i32, i32
  }
  func.func @transform_3(%arg0: i32) -> (i32, i32, i32) {
    %c0_i32 = arith.constant 0 : i32
    %c0_i32_0 = arith.constant 0 : i32
    %c0_i32_1 = arith.constant 0 : i32
    return %arg0, %c0_i32, %c0_i32_0 : i32, i32, i32
  }
}

</mosaic_0001>

<bundles_post_ra>
// kernel: tpu_custom_call.1
= control target key start
LH: loop header
LB: loop body
LE: loop exit
PB: predicated region body
PF: predicated region fallthrough
CT: control target
= control target key end

     0   :  { %8 = vsyncpa [#allocation3], 0  ;;  %s515_s0 = inlined_call_operand.vmem [shape: s32[8,1], index: 0, kind: input, shape index: {}]   ;;  %s516_s1 = inlined_call_operand.vmem [shape: f32[8,128], index: 1, kind: input, shape index: {}]   ;;  %s517_s2 = inlined_call_operand.hbm [shape: f32[1024,128], index: 2, kind: input, shape index: {}]   ;;  %s518_s3 = inlined_call_operand.hbm [shape: f32[1,8,128], index: 3, kind: output, shape index: {}]  }
   0x1   :  { %9 = vsyncpa [#allocation4], 0  ;;  %s18_s14 = sshll.u32 %s517_s2, 4  ;;  %s477_s15 = smov [#allocation2]   ;;  %s19_s14 = int_to_ptr.hbm [resolvable:$true] %s18_s14 }
   0x2   :  { %s20_s16 = sshll.u32 %s477_s15, 4  ;;  %s478_s17 = smov 128   ;;  %s21_s16 = int_to_ptr.vmem [resolvable:$true] %s20_s16 }
   0x3   :  { %s479_s18 = smov 8  }
   0x4   :  { %26 = dma.hbm_to_vmem [thread:$0]  %s19_s14, 16384, %s21_s16, [#allocation3], %s478_s17, %s478_s17, %s479_s18  }
   0x5   :  { %473 = dma.done.wait [#allocation3], 16384  }
   0x6   :  { %474 = vsyncadd [#allocation3], 4294950912  ;;  %v480_v0 = vmov 0   ;;  %v31_v1 = vld [vmem:[%s515_s0] sm:$0xff]  ;;  %v83_v2 = vld [vmem:[#allocation2 + $0x78] sm:$0xff]  ;;  %vm370_vm8 = vcmask 7168  }
   0x7   :  { %424 = vset.pattern.permute.xlu0 %v480_v0  ;;  %v99_v3 = vld [vmem:[#allocation2 + $0xf8] sm:$0xff]  ;;  %196 = vmatpush.msra.mxu0 %v83_v2  ;;  %v82_v6 = vld [vmem:[#allocation2 + $0x70] sm:$0xff]  ;;  %v81_v10 = vld [vmem:[#allocation2 + $0x68] sm:$0xff]  ;;  %s482_s21 = smov [#allocation5]   ;;  %s390_s24 = sshll.u32 %s518_s3, 4  ;;  %s391_s24 = int_to_ptr.hbm [resolvable:$true] %s390_s24 }
   0x8   :  { %42 = vperm.xlu0 %424, %v31_v1   ;;  %v115_v4 = vld [vmem:[#allocation2 + $0x178] sm:$0xff]  ;;  %216 = vmatpush.msra.mxu1 %v99_v3  ;;  %v98_v7 = vld [vmem:[#allocation2 + $0xf0] sm:$0xff]  ;;  %v97_v11 = vld [vmem:[#allocation2 + $0xe8] sm:$0xff] }
   0x9   :  { %v131_v5 = vld [vmem:[#allocation2 + $0x1f8] sm:$0xff]  ;;  %236 = vmatpush.msra.mxu2 %v115_v4  ;;  %v114_v8 = vld [vmem:[#allocation2 + $0x170] sm:$0xff]  ;;  %197 = vmatpush.msra.mxu0 %v82_v6  ;;  %v113_v12 = vld [vmem:[#allocation2 + $0x168] sm:$0xff] }
   0xa   :  { %v130_v9 = vld [vmem:[#allocation2 + $0x1f0] sm:$0xff]  ;;  %256 = vmatpush.msra.mxu3 %v131_v5  ;;  %217 = vmatpush.msra.mxu1 %v98_v7  ;;  %v129_v13 = vld [vmem:[#allocation2 + $0x1e8] sm:$0xff]  ;;  %v80_v14 = vld [vmem:[#allocation2 + $0x60] sm:$0xff] }
   0xb   :  { %237 = vmatpush.msra.mxu2 %v114_v8  ;;  %198 = vmatpush.msra.mxu0 %v81_v10  ;;  %v96_v15 = vld [vmem:[#allocation2 + $0xe0] sm:$0xff]  ;;  %v79_v18 = vld [vmem:[#allocation2 + $0x58] sm:$0xff]  ;;  %v78_v22 = vld [vmem:[#allocation2 + $0x50] sm:$0xff] }
   0xc   :  { %257 = vmatpush.msra.mxu3 %v130_v9  ;;  %v112_v16 = vld [vmem:[#allocation2 + $0x160] sm:$0xff]  ;;  %218 = vmatpush.msra.mxu1 %v97_v11  ;;  %v95_v19 = vld [vmem:[#allocation2 + $0xd8] sm:$0xff]  ;;  %v94_v23 = vld [vmem:[#allocation2 + $0xd0] sm:$0xff] }
   0xd   :  { %238 = vmatpush.msra.mxu2 %v113_v12  ;;  %v128_v17 = vld [vmem:[#allocation2 + $0x1e0] sm:$0xff]  ;;  %199 = vmatpush.msra.mxu0 %v80_v14  ;;  %v111_v20 = vld [vmem:[#allocation2 + $0x158] sm:$0xff]  ;;  %v110_v24 = vld [vmem:[#allocation2 + $0x150] sm:$0xff] }
   0xe   :  { %258 = vmatpush.msra.mxu3 %v129_v13  ;;  %219 = vmatpush.msra.mxu1 %v96_v15  ;;  %v127_v21 = vld [vmem:[#allocation2 + $0x1d8] sm:$0xff]  ;;  %v126_v25 = vld [vmem:[#allocation2 + $0x1d0] sm:$0xff]  ;;  %v77_v26 = vld [vmem:[#allocation2 + $0x48] sm:$0xff] }
   0xf   :  { %239 = vmatpush.msra.mxu2 %v112_v16  ;;  %200 = vmatpush.msra.mxu0 %v79_v18  ;;  %v93_v27 = vld [vmem:[#allocation2 + $0xc8] sm:$0xff]  ;;  %v76_v30 = vld [vmem:[#allocation2 + $0x40] sm:$0xff]  ;;  %v75_v34 = vld [vmem:[#allocation2 + $0x38] sm:$0xff] }
  0x10   :  { %259 = vmatpush.msra.mxu3 %v128_v17  ;;  %220 = vmatpush.msra.mxu1 %v95_v19  ;;  %v109_v28 = vld [vmem:[#allocation2 + $0x148] sm:$0xff]  ;;  %v92_v31 = vld [vmem:[#allocation2 + $0xc0] sm:$0xff]  ;;  %v91_v35 = vld [vmem:[#allocation2 + $0xb8] sm:$0xff] }
  0x11   :  { %240 = vmatpush.msra.mxu2 %v111_v20  ;;  %201 = vmatpush.msra.mxu0 %v78_v22  ;;  %v125_v29 = vld [vmem:[#allocation2 + $0x1c8] sm:$0xff]  ;;  %v108_v32 = vld [vmem:[#allocation2 + $0x140] sm:$0xff]  ;;  %v107_v36 = vld [vmem:[#allocation2 + $0x138] sm:$0xff] }
  0x12   :  { %260 = vmatpush.msra.mxu3 %v127_v21  ;;  %221 = vmatpush.msra.mxu1 %v94_v23  ;;  %v124_v33 = vld [vmem:[#allocation2 + $0x1c0] sm:$0xff]  ;;  %v123_v37 = vld [vmem:[#allocation2 + $0x1b8] sm:$0xff]  ;;  %v74_v38 = vld [vmem:[#allocation2 + $0x30] sm:$0xff] }
  0x13   :  { %241 = vmatpush.msra.mxu2 %v110_v24  ;;  %202 = vmatpush.msra.mxu0 %v77_v26  ;;  %v90_v39 = vld [vmem:[#allocation2 + $0xb0] sm:$0xff]  ;;  %v73_v42 = vld [vmem:[#allocation2 + $0x28] sm:$0xff]  ;;  %v72_v46 = vld [vmem:[#allocation2 + $0x20] sm:$0xff] }
  0x14   :  { %261 = vmatpush.msra.mxu3 %v126_v25  ;;  %222 = vmatpush.msra.mxu1 %v93_v27  ;;  %v106_v40 = vld [vmem:[#allocation2 + $0x130] sm:$0xff]  ;;  %v89_v43 = vld [vmem:[#allocation2 + $0xa8] sm:$0xff]  ;;  %v88_v47 = vld [vmem:[#allocation2 + $0xa0] sm:$0xff] }
  0x15   :  { %242 = vmatpush.msra.mxu2 %v109_v28  ;;  %203 = vmatpush.msra.mxu0 %v76_v30  ;;  %v122_v41 = vld [vmem:[#allocation2 + $0x1b0] sm:$0xff]  ;;  %v105_v44 = vld [vmem:[#allocation2 + $0x128] sm:$0xff]  ;;  %v104_v48 = vld [vmem:[#allocation2 + $0x120] sm:$0xff] }
  0x16   :  { %262 = vmatpush.msra.mxu3 %v125_v29  ;;  %223 = vmatpush.msra.mxu1 %v92_v31  ;;  %v121_v45 = vld [vmem:[#allocation2 + $0x1a8] sm:$0xff]  ;;  %v120_v49 = vld [vmem:[#allocation2 + $0x1a0] sm:$0xff]  ;;  %v71_v50 = vld [vmem:[#allocation2 + $0x18] sm:$0xff] }
  0x17   :  { %243 = vmatpush.msra.mxu2 %v108_v32  ;;  %204 = vmatpush.msra.mxu0 %v75_v34  ;;  %v87_v51 = vld [vmem:[#allocation2 + $0x98] sm:$0xff]  ;;  %v70_v54 = vld [vmem:[#allocation2 + $0x10] sm:$0xff]  ;;  %v69_v58 = vld [vmem:[#allocation2 + $0x8] sm:$0xff] }
  0x18   :  { %263 = vmatpush.msra.mxu3 %v124_v33  ;;  %224 = vmatpush.msra.mxu1 %v91_v35  ;;  %v103_v52 = vld [vmem:[#allocation2 + $0x118] sm:$0xff]  ;;  %v86_v55 = vld [vmem:[#allocation2 + $0x90] sm:$0xff]  ;;  %v85_v59 = vld [vmem:[#allocation2 + $0x88] sm:$0xff] }
  0x19   :  { %244 = vmatpush.msra.mxu2 %v107_v36  ;;  %205 = vmatpush.msra.mxu0 %v74_v38  ;;  %v119_v53 = vld [vmem:[#allocation2 + $0x198] sm:$0xff]  ;;  %v102_v56 = vld [vmem:[#allocation2 + $0x110] sm:$0xff]  ;;  %v101_v60 = vld [vmem:[#allocation2 + $0x108] sm:$0xff] }
  0x1a   :  { %264 = vmatpush.msra.mxu3 %v123_v37  ;;  %225 = vmatpush.msra.mxu1 %v90_v39  ;;  %v118_v57 = vld [vmem:[#allocation2 + $0x190] sm:$0xff]  ;;  %v117_v61 = vld [vmem:[#allocation2 + $0x188] sm:$0xff]  ;;  %v68_v62 = vld [vmem:[#allocation2] sm:$0xff] }
  0x1b   :  { %245 = vmatpush.msra.mxu2 %v106_v40  ;;  %206 = vmatpush.msra.mxu0 %v73_v42  ;;  %v84_v63 = vld [vmem:[#allocation2 + $0x80] sm:$0xff]  ;;  %v147_v2 = vld [vmem:[#allocation2 + $0x278] sm:$0xff]  ;;  %v146_v6 = vld [vmem:[#allocation2 + $0x270] sm:$0xff] }
  0x1c   :  { %265 = vmatpush.msra.mxu3 %v122_v41  ;;  %226 = vmatpush.msra.mxu1 %v89_v43  ;;  %v100_v0 = vld [vmem:[#allocation2 + $0x100] sm:$0xff]  ;;  %v163_v3 = vld [vmem:[#allocation2 + $0x2f8] sm:$0xff]  ;;  %v162_v7 = vld [vmem:[#allocation2 + $0x2f0] sm:$0xff] }
  0x1d   :  { %246 = vmatpush.msra.mxu2 %v105_v44  ;;  %207 = vmatpush.msra.mxu0 %v72_v46  ;;  %v116_v1 = vld [vmem:[#allocation2 + $0x180] sm:$0xff]  ;;  %v179_v4 = vld [vmem:[#allocation2 + $0x378] sm:$0xff]  ;;  %v178_v8 = vld [vmem:[#allocation2 + $0x370] sm:$0xff] }
  0x1e   :  { %266 = vmatpush.msra.mxu3 %v121_v45  ;;  %227 = vmatpush.msra.mxu1 %v88_v47  ;;  %v195_v5 = vld [vmem:[#allocation2 + $0x3f8] sm:$0xff]  ;;  %v194_v9 = vld [vmem:[#allocation2 + $0x3f0] sm:$0xff]  ;;  %v145_v10 = vld [vmem:[#allocation2 + $0x268] sm:$0xff] }
  0x1f   :  { %247 = vmatpush.msra.mxu2 %v104_v48  ;;  %208 = vmatpush.msra.mxu0 %v71_v50  ;;  %v161_v11 = vld [vmem:[#allocation2 + $0x2e8] sm:$0xff]  ;;  %v144_v14 = vld [vmem:[#allocation2 + $0x260] sm:$0xff]  ;;  %v143_v18 = vld [vmem:[#allocation2 + $0x258] sm:$0xff] }
  0x20   :  { %267 = vmatpush.msra.mxu3 %v120_v49  ;;  %228 = vmatpush.msra.mxu1 %v87_v51  ;;  %v177_v12 = vld [vmem:[#allocation2 + $0x368] sm:$0xff]  ;;  %v160_v15 = vld [vmem:[#allocation2 + $0x2e0] sm:$0xff]  ;;  %v159_v19 = vld [vmem:[#allocation2 + $0x2d8] sm:$0xff] }
  0x21   :  { %248 = vmatpush.msra.mxu2 %v103_v52  ;;  %209 = vmatpush.msra.mxu0 %v70_v54  ;;  %v193_v13 = vld [vmem:[#allocation2 + $0x3e8] sm:$0xff]  ;;  %v176_v16 = vld [vmem:[#allocation2 + $0x360] sm:$0xff]  ;;  %v175_v20 = vld [vmem:[#allocation2 + $0x358] sm:$0xff] }
  0x22   :  { %268 = vmatpush.msra.mxu3 %v119_v53  ;;  %229 = vmatpush.msra.mxu1 %v86_v55  ;;  %v192_v17 = vld [vmem:[#allocation2 + $0x3e0] sm:$0xff]  ;;  %v191_v21 = vld [vmem:[#allocation2 + $0x3d8] sm:$0xff]  ;;  %v142_v22 = vld [vmem:[#allocation2 + $0x250] sm:$0xff] }
  0x23   :  { %249 = vmatpush.msra.mxu2 %v102_v56  ;;  %210 = vmatpush.msra.mxu0 %v69_v58  ;;  %v158_v23 = vld [vmem:[#allocation2 + $0x2d0] sm:$0xff]  ;;  %v141_v26 = vld [vmem:[#allocation2 + $0x248] sm:$0xff]  ;;  %v140_v30 = vld [vmem:[#allocation2 + $0x240] sm:$0xff] }
  0x24   :  { %269 = vmatpush.msra.mxu3 %v118_v57  ;;  %230 = vmatpush.msra.mxu1 %v85_v59  ;;  %v174_v24 = vld [vmem:[#allocation2 + $0x350] sm:$0xff]  ;;  %v157_v27 = vld [vmem:[#allocation2 + $0x2c8] sm:$0xff]  ;;  %v156_v31 = vld [vmem:[#allocation2 + $0x2c0] sm:$0xff] }
  0x25   :  { %250 = vmatpush.msra.mxu2 %v101_v60  ;;  %211 = vmatpush.msra.mxu0 %v68_v62  ;;  %v190_v25 = vld [vmem:[#allocation2 + $0x3d0] sm:$0xff]  ;;  %v173_v28 = vld [vmem:[#allocation2 + $0x348] sm:$0xff]  ;;  %v172_v32 = vld [vmem:[#allocation2 + $0x340] sm:$0xff] }
  0x26   :  { %270 = vmatpush.msra.mxu3 %v117_v61  ;;  %231 = vmatpush.msra.mxu1 %v84_v63  ;;  %v189_v29 = vld [vmem:[#allocation2 + $0x3c8] sm:$0xff]  ;;  %v188_v33 = vld [vmem:[#allocation2 + $0x3c0] sm:$0xff]  ;;  %v139_v34 = vld [vmem:[#allocation2 + $0x238] sm:$0xff] }
  0x27   :  { %251 = vmatpush.msra.mxu2 %v100_v0  ;;  %276 = vmatpush.msrb.mxu0 %v147_v2  ;;  %v155_v35 = vld [vmem:[#allocation2 + $0x2b8] sm:$0xff]  ;;  %v138_v38 = vld [vmem:[#allocation2 + $0x230] sm:$0xff]  ;;  %v137_v42 = vld [vmem:[#allocation2 + $0x228] sm:$0xff]  ;;  %v32_v2 = vlaneseq }
  0x28   :  { %271 = vmatpush.msra.mxu3 %v116_v1  ;;  %296 = vmatpush.msrb.mxu1 %v163_v3  ;;  %v171_v36 = vld [vmem:[#allocation2 + $0x338] sm:$0xff]  ;;  %v154_v39 = vld [vmem:[#allocation2 + $0x2b0] sm:$0xff]  ;;  %v153_v43 = vld [vmem:[#allocation2 + $0x2a8] sm:$0xff] }
  0x29   :  { %316 = vmatpush.msrb.mxu2 %v179_v4  ;;  %277 = vmatpush.msrb.mxu0 %v146_v6  ;;  %v187_v37 = vld [vmem:[#allocation2 + $0x3b8] sm:$0xff]  ;;  %v170_v40 = vld [vmem:[#allocation2 + $0x330] sm:$0xff]  ;;  %v169_v44 = vld [vmem:[#allocation2 + $0x328] sm:$0xff]  ;;  %v33_v3 = vand.u32 127, %v32_v2 }
  0x2a   :  { %336 = vmatpush.msrb.mxu3 %v195_v5  ;;  %297 = vmatpush.msrb.mxu1 %v162_v7  ;;  %v186_v41 = vld [vmem:[#allocation2 + $0x3b0] sm:$0xff]  ;;  %v185_v45 = vld [vmem:[#allocation2 + $0x3a8] sm:$0xff]  ;;  %v136_v46 = vld [vmem:[#allocation2 + $0x220] sm:$0xff] }
  0x2b   :  { %317 = vmatpush.msrb.mxu2 %v178_v8  ;;  %278 = vmatpush.msrb.mxu0 %v145_v10  ;;  %v152_v47 = vld [vmem:[#allocation2 + $0x2a0] sm:$0xff]  ;;  %v135_v50 = vld [vmem:[#allocation2 + $0x218] sm:$0xff]  ;;  %v134_v54 = vld [vmem:[#allocation2 + $0x210] sm:$0xff]  ;;  %v34_v4 = vadd.s32 128, %v33_v3  ;;  %v35_v5 = vadd.s32 256, %v33_v3  ;;  %v36_v6 = vadd.s32 384, %v33_v3 }
  0x2c   :  { %337 = vmatpush.msrb.mxu3 %v194_v9  ;;  %298 = vmatpush.msrb.mxu1 %v161_v11  ;;  %v168_v48 = vld [vmem:[#allocation2 + $0x320] sm:$0xff]  ;;  %v151_v51 = vld [vmem:[#allocation2 + $0x298] sm:$0xff]  ;;  %v150_v55 = vld [vmem:[#allocation2 + $0x290] sm:$0xff]  ;;  %v481_v8 = vmov 1.0   ;;  %v37_v9 = vadd.s32 512, %v33_v3  ;;  %v38_v10 = vadd.s32 640, %v33_v3 }
  0x2d   :  { %318 = vmatpush.msrb.mxu2 %v177_v12  ;;  %279 = vmatpush.msrb.mxu0 %v144_v14  ;;  %v184_v49 = vld [vmem:[#allocation2 + $0x3a0] sm:$0xff]  ;;  %v167_v52 = vld [vmem:[#allocation2 + $0x318] sm:$0xff]  ;;  %v166_v56 = vld [vmem:[#allocation2 + $0x310] sm:$0xff]  ;;  %v39_v11 = vadd.s32 768, %v33_v3  ;;  %v40_v12 = vadd.s32 896, %v33_v3 }
  0x2e   :  { %338 = vmatpush.msrb.mxu3 %v193_v13  ;;  %299 = vmatpush.msrb.mxu1 %v160_v15  ;;  %v183_v53 = vld [vmem:[#allocation2 + $0x398] sm:$0xff]  ;;  %v182_v57 = vld [vmem:[#allocation2 + $0x390] sm:$0xff]  ;;  %v133_v58 = vld [vmem:[#allocation2 + $0x208] sm:$0xff] }
  0x2f   :  { %319 = vmatpush.msrb.mxu2 %v176_v16  ;;  %280 = vmatpush.msrb.mxu0 %v143_v18  ;;  %v149_v59 = vld [vmem:[#allocation2 + $0x288] sm:$0xff]  ;;  %v132_v62 = vld [vmem:[#allocation2 + $0x200] sm:$0xff] }
  0x30   :  { %339 = vmatpush.msrb.mxu3 %v192_v17  ;;  %300 = vmatpush.msrb.mxu1 %v159_v19  ;;  %v165_v60 = vld [vmem:[#allocation2 + $0x308] sm:$0xff]  ;;  %v148_v63 = vld [vmem:[#allocation2 + $0x280] sm:$0xff] }
  0x31   :  { %320 = vmatpush.msrb.mxu2 %v175_v20  ;;  %281 = vmatpush.msrb.mxu0 %v142_v22  ;;  %v181_v61 = vld [vmem:[#allocation2 + $0x388] sm:$0xff]  ;;  %v164_v0 = vld [vmem:[#allocation2 + $0x300] sm:$0xff] }
  0x32   :  { %340 = vmatpush.msrb.mxu3 %v191_v21  ;;  %301 = vmatpush.msrb.mxu1 %v158_v23  ;;  %v180_v1 = vld [vmem:[#allocation2 + $0x380] sm:$0xff] }
  0x33   :  { %321 = vmatpush.msrb.mxu2 %v174_v24  ;;  %282 = vmatpush.msrb.mxu0 %v141_v26 }
  0x34   :  { %341 = vmatpush.msrb.mxu3 %v190_v25  ;;  %302 = vmatpush.msrb.mxu1 %v157_v27  ;;  %v356_v27 = vld [vmem:[%s516_s1] sm:$0xff]  ;;  %s388_s1 = sshll.u32 %s482_s21, 4  ;;  %s389_s1 = int_to_ptr.vmem [resolvable:$true] %s388_s1 }
  0x35   :  { %322 = vmatpush.msrb.mxu2 %v173_v28  ;;  %283 = vmatpush.msrb.mxu0 %v140_v30 }
  0x36   :  { %342 = vmatpush.msrb.mxu3 %v189_v29  ;;  %303 = vmatpush.msrb.mxu1 %v156_v31 }
  0x37   :  { %323 = vmatpush.msrb.mxu2 %v172_v32  ;;  %284 = vmatpush.msrb.mxu0 %v139_v34 }
  0x38   :  { %343 = vmatpush.msrb.mxu3 %v188_v33  ;;  %304 = vmatpush.msrb.mxu1 %v155_v35 }
  0x39   :  { %324 = vmatpush.msrb.mxu2 %v171_v36  ;;  %285 = vmatpush.msrb.mxu0 %v138_v38 }
  0x3a   :  { %344 = vmatpush.msrb.mxu3 %v187_v37  ;;  %305 = vmatpush.msrb.mxu1 %v154_v39 }
  0x3b   :  { %325 = vmatpush.msrb.mxu2 %v170_v40  ;;  %286 = vmatpush.msrb.mxu0 %v137_v42 }
  0x3c   :  { %345 = vmatpush.msrb.mxu3 %v186_v41  ;;  %306 = vmatpush.msrb.mxu1 %v153_v43 }
  0x3d   :  { %326 = vmatpush.msrb.mxu2 %v169_v44  ;;  %287 = vmatpush.msrb.mxu0 %v136_v46 }
  0x3e   :  { %346 = vmatpush.msrb.mxu3 %v185_v45  ;;  %307 = vmatpush.msrb.mxu1 %v152_v47 }
  0x3f   :  { %327 = vmatpush.msrb.mxu2 %v168_v48  ;;  %288 = vmatpush.msrb.mxu0 %v135_v50 }
  0x40   :  { %347 = vmatpush.msrb.mxu3 %v184_v49  ;;  %308 = vmatpush.msrb.mxu1 %v151_v51 }
  0x41   :  { %328 = vmatpush.msrb.mxu2 %v167_v52  ;;  %289 = vmatpush.msrb.mxu0 %v134_v54 }
  0x42   :  { %348 = vmatpush.msrb.mxu3 %v183_v53  ;;  %309 = vmatpush.msrb.mxu1 %v150_v55 }
  0x43   :  { %329 = vmatpush.msrb.mxu2 %v166_v56  ;;  %290 = vmatpush.msrb.mxu0 %v133_v58 }
  0x44   :  { %349 = vmatpush.msrb.mxu3 %v182_v57  ;;  %310 = vmatpush.msrb.mxu1 %v149_v59 }
  0x45   :  { %330 = vmatpush.msrb.mxu2 %v165_v60  ;;  %291 = vmatpush.msrb.mxu0 %v132_v62 }
  0x46   :  { %350 = vmatpush.msrb.mxu3 %v181_v61  ;;  %311 = vmatpush.msrb.mxu1 %v148_v63 }
  0x47   :  { %331 = vmatpush.msrb.mxu2 %v164_v0 }
  0x48   :  { %351 = vmatpush.msrb.mxu3 %v180_v1 }
  0x7a   :  { %v43_v7 = vpop.permute.xlu0 %42 }
  0x7b   :  { %vm44_vm0 = vcmp.eq.s32.totalorder %v43_v7, %v33_v3  ;;  %vm45_vm1 = vcmp.eq.s32.totalorder %v43_v7, %v34_v4  ;;  %vm46_vm2 = vcmp.eq.s32.totalorder %v43_v7, %v35_v5  ;;  %vm47_vm3 = vcmp.eq.s32.totalorder %v43_v7, %v36_v6 }
  0x7c   :  { %408 = vmatmul.msk.f32.vlgmr.msra.gmra.mxu0 %vm44_vm0, %v481_v8  ;;  %409 = vmatmul.msk.f32.vlgmr.msra.gmra.mxu1 %vm45_vm1, %v481_v8  ;;  %vm48_vm4 = vcmp.eq.s32.totalorder %v43_v7, %v37_v9  ;;  %vm49_vm5 = vcmp.eq.s32.totalorder %v43_v7, %v38_v10  ;;  %vm50_vm6 = vcmp.eq.s32.totalorder %v43_v7, %v39_v11 }
  0x7d   :  { %410 = vmatmul.msk.f32.vlgmr.msra.gmra.mxu2 %vm46_vm2, %v481_v8  ;;  %411 = vmatmul.msk.f32.vlgmr.msra.gmra.mxu3 %vm47_vm3, %v481_v8  ;;  %vm51_vm7 = vcmp.eq.s32.totalorder %v43_v7, %v40_v12 }
  0x84   :  { %412 = vmatmul.msk.f32.vlgmr.msrb.gmra.mxu0 %vm48_vm4, %v481_v8  ;;  %413 = vmatmul.msk.f32.vlgmr.msrb.gmra.mxu1 %vm49_vm5, %v481_v8 }
  0x85   :  { %414 = vmatmul.msk.f32.vlgmr.msrb.gmra.mxu2 %vm50_vm6, %v481_v8  ;;  %415 = vmatmul.msk.f32.vlgmr.msrb.gmra.mxu3 %vm51_vm7, %v481_v8 }
  0xf9   :  { %v213_v13 = vpop.f32.mrf.mxu0  ;;  %v233_v14 = vpop.f32.mrf.mxu1 }
  0xfa   :  { %v234_v15 = vadd.f32 %v233_v14, %v213_v13 }
 0x100   :  { %v253_v16 = vpop.f32.mrf.mxu2  ;;  %v273_v17 = vpop.f32.mrf.mxu3 }
 0x101   :  { %v254_v18 = vadd.f32 %v253_v16, %v234_v15  ;;  %v293_v20 = vpop.f32.mrf.mxu0  ;;  %v313_v22 = vpop.f32.mrf.mxu1 }
 0x103   :  { %v274_v19 = vadd.f32 %v273_v17, %v254_v18 }
 0x105   :  { %v294_v21 = vadd.f32 %v293_v20, %v274_v19 }
 0x107   :  { %v314_v23 = vadd.f32 %v313_v22, %v294_v21 }
 0x108   :  { %v333_v24 = vpop.f32.mrf.mxu2  ;;  %v353_v26 = vpop.f32.mrf.mxu3 }
 0x109   :  { %v334_v25 = vadd.f32 %v333_v24, %v314_v23 }
 0x10b   :  { %v354_v28 = vadd.f32 %v353_v26, %v334_v25 }
 0x10d   :  { %v357_v29 = vsub.f32 %v356_v27, %v354_v28 }
 0x10f   :  { %v358_v30 = vmul.f32 %v357_v29, %v357_v29 }
 0x111   :  { %359 = vadd.xlane.f32.xlu0 %v358_v30 }
 0x184   :  { %v360_v31 = vpop.xlane.xlu0 %359 }
 0x185   :  { %v361_v32 = vmax.f32 %v360_v31, 1e-12 }
 0x187   :  { %v362_v33 = vmin.f32 %v361_v32, 1e+12 }
 0x189   :  { %v371_v34 = vsel %vm370_vm8, %v362_v33, 0.0 }
 0x18a   :  { %372 = vadd.xlane.f32.xlu1 %v371_v34 }
 0x1fd   :  { %v373_v35 = vpop.xlane.xlu1 %372 }
 0x1fe   :  { %v374_v36 = vrot.slane %v373_v35, 4 }
 0x200   :  { %v375_v37 = vadd.f32 %v374_v36, %v373_v35 }
 0x202   :  { %v376_v38 = vrot.slane %v375_v37, 2 }
 0x204   :  { %v377_v39 = vadd.f32 %v376_v38, %v375_v37 }
 0x206   :  { %v378_v40 = vrot.slane %v377_v39, 1 }
 0x208   :  { %v379_v41 = vadd.f32 %v378_v40, %v377_v39 }
 0x20a   :  { %416 = vpush %v379_v41 }
 0x23b   :  { %s417_s25 = spop %416 }
 0x23c   :  { %v381_v42 = vstv %s417_s25 }
 0x23d   :  { %382 = vst [vmem:[#allocation5] sm:$0xff] %v381_v42 }
 0x23e   :  { %393 = dma.vmem_to_hbm [thread:$0]  %s389_s1, 128, %s391_s24, [#allocation4]  }
 0x23f   :  { %475 = dma.done.wait [#allocation4], 128  }
 0x240   :  { %476 = vsyncadd [#allocation4], 4294967168 }
 0x241   :  { %398 = vsyncpa [#allocation3], 1 }
 0x242   :  { %399 = vsyncpa [#allocation4], 1 }

</bundles_post_ra>
